<compile_context>
chip_gen: v5e
topology: v5e:2x2
jax: 0.10.0
libtpu: 0.0.40
codegen_flags: <defaults>
</compile_context>

<pallas_src>
import functools

import jax
import jax.numpy as jnp
from jax.experimental import pallas as pl
from jax.experimental.pallas import tpu as pltpu

EPS = 1e-5


def _round_up(x, m):
    return (x + m - 1) // m * m


def _cdiv(a, b):
    return (a + b - 1) // b


def _sublane_multiple(dtype):
    return {4: 8, 2: 16, 1: 32}.get(jnp.dtype(dtype).itemsize, 8)


def _vmem_capacity_bytes():
    try:
        info = pltpu.get_tpu_info()
        return int(getattr(info, "vmem_capacity_bytes", 64 * 1024 * 1024))
    except Exception:
        return 64 * 1024 * 1024  # conservative (v7x) fallback


def _phase_planes(x, pad, stride, Hq, Wq, Cin_pad, F_in):
    """Rearrange padded x into stride^2 phase planes, flattened & lane-padded.

    planes[n, a*stride + b, ci, i*Wq + j] = x_pad[n, ci, stride*i + a, stride*j + b]
    Result: (N, stride^2, Cin_pad, F_in) -- ~1x input-sized copy in XLA
    (replaces the 2.25x im2col materialization).
    """
    N, C, _, _ = x.shape
    xp = jnp.pad(x, ((0, 0), (0, 0), (pad, pad), (pad, pad)))
    planes = []
    for a in range(stride):
        for b in range(stride):
            q = xp[:, :, a::stride, b::stride]
            q = q[:, :, :Hq, :Wq]
            q = jnp.pad(q, ((0, 0), (0, 0),
                            (0, Hq - q.shape[2]), (0, Wq - q.shape[3])))
            planes.append(q.reshape(N, C, Hq * Wq))
    ph = jnp.stack(planes, axis=1)                         # (N, s^2, C, Hq*Wq)
    return jnp.pad(ph, ((0, 0), (0, 0), (0, Cin_pad - C), (0, F_in - Hq * Wq)))


def _make_kernel(K, stride, Wq, F_out, n_valid, use_instance_norm):
    """Per-(image, Cout-chunk) kernel: conv as K*K accumulated GEMMs + IN + ReLU."""

    def kernel(ph_ref, w_ref, b_ref, m_ref, o_ref, acc_ref):
        # ph_ref : (1, stride^2, Cin_pad, F_in)  flattened phase planes (1 image)
        # w_ref  : (K*K, CO_T, Cin_pad)          per-tap weights (1 Cout chunk)
        # b_ref  : (CO_T, 1) f32                 conv bias
        # m_ref  : (1, F_out) f32                1.0 on valid output lanes
        # o_ref  : (1, CO_T, F_out)              lane-dense output block
        # acc_ref: (CO_T, F_out) f32             MXU accumulator (VMEM scratch)
        first = True
        for kh in range(K):
            pa, dr = kh % stride, kh // stride
            for kw in range(K):
                pb, dc = kw % stride, kw // stride
                off = dr * Wq + dc                       # static lane offset
                rhs = ph_ref[0, pa * stride + pb, :, off:off + F_out]
                lhs = w_ref[kh * K + kw]                 # (CO_T, Cin_pad)
                part = jnp.dot(lhs, rhs, preferred_element_type=jnp.float32)
                if first:
                    acc_ref[...] = part
                    first = False
                else:
                    acc_ref[...] += part

        y = acc_ref[...] + b_ref[...]                    # (CO_T, F_out) f32
        if use_instance_norm:
            # InstanceNorm2d: biased variance, eps=1e-5, affine=False.
            ym = y * m_ref[...]                          # zero out junk lanes
            inv_n = 1.0 / n_valid
            mean = jnp.sum(ym, axis=1, keepdims=True) * inv_n
            var = jnp.maximum(
                jnp.sum(ym * ym, axis=1, keepdims=True) * inv_n - mean * mean,
                0.0)
            inv_std = jax.lax.rsqrt(var + EPS)
            out = jnp.maximum((y - mean) * inv_std, 0.0)
        else:
            out = jnp.maximum(y, 0.0)
        o_ref[0] = out.astype(o_ref.dtype)

    return kernel


def conv_block_forward(x, weight, bias, kernel_size=3, stride=2, padding=1,
                       use_instance_norm=True):
    """ConvBlock forward. x: (N, Cin, H, W) NCHW. Returns (N, Cout, Ho, Wo)."""
    N, Cin, H, W = x.shape
    Cout = weight.shape[0]
    K, s, p = kernel_size, stride, padding

    Ho = (H + 2 * p - K) // s + 1
    Wo = (W + 2 * p - K) // s + 1
    shift = (K - 1) // s                       # per-axis in-kernel window shift
    Hq, Wq = Ho + shift, Wo + shift
    n_phase = s * s

    sub = _sublane_multiple(x.dtype)
    Cin_pad = _round_up(Cin, sub)
    Cout_pad = _round_up(Cout, sub)

    # Lane-dense flattened spatial axis (always a multiple of 128 lanes).
    F_out = _round_up(Ho * Wq, 128)
    F_in = _round_up(F_out + shift * (Wq + 1), 128)

    itemsize = jnp.dtype(x.dtype).itemsize
    vmem_cap = _vmem_capacity_bytes()

    # Split Cout so the f32 accumulator / output slab per grid step stays
    # bounded (v7x: 64 MiB physical VMEM) and N=1 still feeds both v7x cores.
    slab_budget = max(2 << 20, vmem_cap // 12)
    n_co = max(1, _cdiv(Cout_pad * F_out * 4, slab_budget))
    CO_T = _round_up(_cdiv(Cout_pad, n_co), sub)
    n_co = _cdiv(Cout_pad, CO_T)
    Cout_tot = n_co * CO_T

    # Kernel inputs (all rearrangement here is ~1x input-sized; no im2col).
    phases = _phase_planes(x, p, s, Hq, Wq, Cin_pad, F_in)
    w_taps = jnp.transpose(weight.reshape(Cout, Cin, K * K), (2, 0, 1))
    w_taps = jnp.pad(w_taps, ((0, 0), (0, Cout_tot - Cout),
                              (0, Cin_pad - Cin))).astype(x.dtype)
    b_mat = jnp.pad(bias.astype(jnp.float32),
                    (0, Cout_tot - Cout)).reshape(Cout_tot, 1)
    j = jnp.arange(F_out)
    mask = (((j % Wq) < Wo) & (j < Ho * Wq)).astype(jnp.float32).reshape(1, F_out)

    # Generation-aware VMEM budget (double-buffered inputs/outputs + scratch +
    # a few f32 temporaries in the normalization epilogue).
    per_step = (2 * n_phase * Cin_pad * F_in * itemsize
                + 2 * K * K * CO_T * Cin_pad * itemsize
                + 2 * CO_T * 128 * 4 + 2 * F_out * 4
                + 2 * CO_T * F_out * itemsize
                + 5 * CO_T * F_out * 4)
    vmem_limit = int(min(max(32 * 1024 * 1024, per_step + (4 << 20)),
                         int(0.95 * vmem_cap)))

    flops = 2 * N * Ho * Wo * K * K * Cin * Cout
    bytes_accessed = (N * n_phase * Cin_pad * F_in * itemsize
                      + K * K * Cout_tot * Cin_pad * itemsize
                      + Cout_tot * 4 + F_out * 4
                      + N * Cout_tot * F_out * itemsize)

    kernel = _make_kernel(K, s, Wq, F_out, Ho * Wo, use_instance_norm)

    out_flat = pl.pallas_call(
        kernel,
        out_shape=jax.ShapeDtypeStruct((N, Cout_tot, F_out), x.dtype),
        grid_spec=pltpu.PrefetchScalarGridSpec(
            num_scalar_prefetch=0,
            grid=(N, n_co),
            in_specs=[
                pl.BlockSpec((1, n_phase, Cin_pad, F_in),
                             lambda n, c: (n, 0, 0, 0)),
                pl.BlockSpec((K * K, CO_T, Cin_pad), lambda n, c: (0, c, 0)),
                pl.BlockSpec((CO_T, 1), lambda n, c: (c, 0)),
                pl.BlockSpec((1, F_out), lambda n, c: (0, 0)),
            ],
            out_specs=pl.BlockSpec((1, CO_T, F_out), lambda n, c: (n, c, 0)),
            scratch_shapes=[pltpu.VMEM((CO_T, F_out), jnp.float32)],
        ),
        compiler_params=pltpu.CompilerParams(
            dimension_semantics=("parallel", "parallel"),
            vmem_limit_bytes=vmem_limit),
        cost_estimate=pl.CostEstimate(flops=flops, transcendentals=N * Cout,
                                      bytes_accessed=bytes_accessed),
    )(phases, w_taps, b_mat, mask)

    # (N, Cout_tot, F_out) -> (N, Cout, Ho, Wo): drop padded channels, drop the
    # junk lanes introduced by the Wq-strided flattening (cheap output-sized slice).
    out = out_flat[:, :Cout, :Ho * Wq].reshape(N, Cout, Ho, Wq)[:, :, :, :Wo]
    return out


def _reference_forward(x, weight, bias, stride=2, padding=1,
                       use_instance_norm=True):
    y = jax.lax.conv_general_dilated(
        x, weight, window_strides=(stride, stride),
        padding=((padding, padding), (padding, padding)),
        dimension_numbers=("NCHW", "OIHW", "NCHW"))
    y = y + bias[None, :, None, None]
    if use_instance_norm:
        mean = y.mean(axis=(2, 3), keepdims=True)
        var = ((y - mean) ** 2).mean(axis=(2, 3), keepdims=True)
        y = (y - mean) / jnp.sqrt(var + EPS)
    return jnp.maximum(y, 0.0)


if __name__ == "__main__":
    # Small shapes consistent with the module: N=2, Cin=4, H=W=16, Cout=8.
    N, Cin, H, W = 2, 4, 16, 16
    Cout, K = 8, 3

    key = jax.random.PRNGKey(0)
    kx, kw, kb = jax.random.split(key, 3)
    x = jax.random.normal(kx, (N, Cin, H, W), dtype=jnp.float32)
    weight = 0.1 * jax.random.normal(kw, (Cout, Cin, K, K), dtype=jnp.float32)
    bias = 0.1 * jax.random.normal(kb, (Cout,), dtype=jnp.float32)

    fwd = jax.jit(functools.partial(conv_block_forward, kernel_size=K,
                                    stride=2, padding=1,
                                    use_instance_norm=True))
    out = jax.block_until_ready(fwd(x, weight, bias))
    ref = _reference_forward(x, weight, bias)
    assert out.shape == (N, Cout, H // 2, W // 2), out.shape
    assert jnp.allclose(out, ref, atol=1e-4, rtol=1e-4), float(
        jnp.max(jnp.abs(out - ref)))

    # Norm-free ConvBlock variant (use_instance_norm=False).
    fwd_nn = jax.jit(functools.partial(conv_block_forward, kernel_size=K,
                                       stride=2, padding=1,
                                       use_instance_norm=False))
    out_nn = jax.block_until_ready(fwd_nn(x, weight, bias))
    ref_nn = _reference_forward(x, weight, bias, use_instance_norm=False)
    assert jnp.allclose(out_nn, ref_nn, atol=1e-4, rtol=1e-4), float(
        jnp.max(jnp.abs(out_nn - ref_nn)))

    print("KERNEL_OK")
</pallas_src>

<mosaic_0001>
module attributes {stable_mosaic.version = 11 : i64} {
  func.func @kernel(%arg0: i32, %arg1: i32, %arg2: memref<1x4x8x256xf32, #tpu.memory_space<vmem>>, %arg3: memref<9x8x8xf32, #tpu.memory_space<vmem>>, %arg4: memref<8x1xf32, #tpu.memory_space<vmem>>, %arg5: memref<1x128xf32, #tpu.memory_space<vmem>>, %arg6: memref<1x8x128xf32, #tpu.memory_space<vmem>>, %arg7: memref<8x128xf32, #tpu.memory_space<vmem>>) attributes {dimension_semantics = [#tpu.dimension_semantics<parallel>, #tpu.dimension_semantics<parallel>], iteration_bounds = array<i64: 2, 1>, scalar_prefetch = 0 : i64, scratch_operands = 1 : i64, tpu.core_type = #tpu.core_type<tc>, window_params = [{transform_indices = @transform_0, window_bounds = array<i64: 1, 4, 8, 256>}, {transform_indices = @transform_1, window_bounds = array<i64: 9, 8, 8>}, {transform_indices = @transform_2, window_bounds = array<i64: 8, 1>}, {pipeline_mode = #tpu.pipeline_mode<synchronous>, transform_indices = @transform_3, window_bounds = array<i64: 1, 128>}, {transform_indices = @transform_4, window_bounds = array<i64: 1, 8, 128>}]} {
    %c0 = arith.constant 0 : index
    %c0_0 = arith.constant 0 : index
    %c0_1 = arith.constant 0 : index
    %c0_2 = arith.constant 0 : index
    %0 = vector.load %arg2[%c0, %c0_0, %c0_1, %c0_2] : memref<1x4x8x256xf32, #tpu.memory_space<vmem>>, vector<1x1x8x128xf32>
    %1 = vector.shape_cast %0 : vector<1x1x8x128xf32> to vector<8x128xf32>
    %c0_3 = arith.constant 0 : index
    %c0_4 = arith.constant 0 : index
    %c0_5 = arith.constant 0 : index
    %2 = vector.load %arg3[%c0_3, %c0_4, %c0_5] : memref<9x8x8xf32, #tpu.memory_space<vmem>>, vector<1x8x8xf32>
    %3 = vector.shape_cast %2 : vector<1x8x8xf32> to vector<8x8xf32>
    %cst = arith.constant dense<0.000000e+00> : vector<8x128xf32>
    %4 = tpu.matmul %3, %1, %cst {dimension_numbers = #tpu.dot_dimension_numbers<[1], [0], [0], [1], [0, 0, 1, 1], [], []>} : vector<8x8xf32>, vector<8x128xf32>, vector<8x128xf32> -> vector<8x128xf32>
    %c0_6 = arith.constant 0 : index
    %c0_7 = arith.constant 0 : index
    %5 = vector.load %arg7[%c0_6, %c0_7] : memref<8x128xf32, #tpu.memory_space<vmem>>, vector<8x128xf32>
    tpu.vector_store %arg7[%c0_6, %c0_7], %4 {strides = array<i32>} : memref<8x128xf32, #tpu.memory_space<vmem>>, vector<8x128xf32>,
    %c0_8 = arith.constant 0 : index
    %c1 = arith.constant 1 : index
    %c0_9 = arith.constant 0 : index
    %c0_10 = arith.constant 0 : index
    %6 = vector.load %arg2[%c0_8, %c1, %c0_9, %c0_10] : memref<1x4x8x256xf32, #tpu.memory_space<vmem>>, vector<1x1x8x128xf32>
    %7 = vector.shape_cast %6 : vector<1x1x8x128xf32> to vector<8x128xf32>
    %c1_11 = arith.constant 1 : index
    %c0_12 = arith.constant 0 : index
    %c0_13 = arith.constant 0 : index
    %8 = vector.load %arg3[%c1_11, %c0_12, %c0_13] : memref<9x8x8xf32, #tpu.memory_space<vmem>>, vector<1x8x8xf32>
    %9 = vector.shape_cast %8 : vector<1x8x8xf32> to vector<8x8xf32>
    %cst_14 = arith.constant dense<0.000000e+00> : vector<8x128xf32>
    %10 = tpu.matmul %9, %7, %cst_14 {dimension_numbers = #tpu.dot_dimension_numbers<[1], [0], [0], [1], [0, 0, 1, 1], [], []>} : vector<8x8xf32>, vector<8x128xf32>, vector<8x128xf32> -> vector<8x128xf32>
    %c0_15 = arith.constant 0 : index
    %c0_16 = arith.constant 0 : index
    %11 = vector.load %arg7[%c0_15, %c0_16] : memref<8x128xf32, #tpu.memory_space<vmem>>, vector<8x128xf32>
    %12 = arith.addf %11, %10 : vector<8x128xf32>
    %c0_17 = arith.constant 0 : index
    %c0_18 = arith.constant 0 : index
    %13 = vector.load %arg7[%c0_17, %c0_18] : memref<8x128xf32, #tpu.memory_space<vmem>>, vector<8x128xf32>
    tpu.vector_store %arg7[%c0_17, %c0_18], %12 {strides = array<i32>} : memref<8x128xf32, #tpu.memory_space<vmem>>, vector<8x128xf32>,
    %c0_19 = arith.constant 0 : index
    %c0_20 = arith.constant 0 : index
    %c0_21 = arith.constant 0 : index
    %c1_22 = arith.constant 1 : index
    %14 = vector.load %arg2[%c0_19, %c0_20, %c0_21, %c1_22] : memref<1x4x8x256xf32, #tpu.memory_space<vmem>>, vector<1x1x8x128xf32>
    %15 = vector.shape_cast %14 : vector<1x1x8x128xf32> to vector<8x128xf32>
    %c2 = arith.constant 2 : index
    %c0_23 = arith.constant 0 : index
    %c0_24 = arith.constant 0 : index
    %16 = vector.load %arg3[%c2, %c0_23, %c0_24] : memref<9x8x8xf32, #tpu.memory_space<vmem>>, vector<1x8x8xf32>
    %17 = vector.shape_cast %16 : vector<1x8x8xf32> to vector<8x8xf32>
    %cst_25 = arith.constant dense<0.000000e+00> : vector<8x128xf32>
    %18 = tpu.matmul %17, %15, %cst_25 {dimension_numbers = #tpu.dot_dimension_numbers<[1], [0], [0], [1], [0, 0, 1, 1], [], []>} : vector<8x8xf32>, vector<8x128xf32>, vector<8x128xf32> -> vector<8x128xf32>
    %c0_26 = arith.constant 0 : index
    %c0_27 = arith.constant 0 : index
    %19 = vector.load %arg7[%c0_26, %c0_27] : memref<8x128xf32, #tpu.memory_space<vmem>>, vector<8x128xf32>
    %20 = arith.addf %19, %18 : vector<8x128xf32>
    %c0_28 = arith.constant 0 : index
    %c0_29 = arith.constant 0 : index
    %21 = vector.load %arg7[%c0_28, %c0_29] : memref<8x128xf32, #tpu.memory_space<vmem>>, vector<8x128xf32>
    tpu.vector_store %arg7[%c0_28, %c0_29], %20 {strides = array<i32>} : memref<8x128xf32, #tpu.memory_space<vmem>>, vector<8x128xf32>,
    %c0_30 = arith.constant 0 : index
    %c2_31 = arith.constant 2 : index
    %c0_32 = arith.constant 0 : index
    %c0_33 = arith.constant 0 : index
    %22 = vector.load %arg2[%c0_30, %c2_31, %c0_32, %c0_33] : memref<1x4x8x256xf32, #tpu.memory_space<vmem>>, vector<1x1x8x128xf32>
    %23 = vector.shape_cast %22 : vector<1x1x8x128xf32> to vector<8x128xf32>
    %c3 = arith.constant 3 : index
    %c0_34 = arith.constant 0 : index
    %c0_35 = arith.constant 0 : index
    %24 = vector.load %arg3[%c3, %c0_34, %c0_35] : memref<9x8x8xf32, #tpu.memory_space<vmem>>, vector<1x8x8xf32>
    %25 = vector.shape_cast %24 : vector<1x8x8xf32> to vector<8x8xf32>
    %cst_36 = arith.constant dense<0.000000e+00> : vector<8x128xf32>
    %26 = tpu.matmul %25, %23, %cst_36 {dimension_numbers = #tpu.dot_dimension_numbers<[1], [0], [0], [1], [0, 0, 1, 1], [], []>} : vector<8x8xf32>, vector<8x128xf32>, vector<8x128xf32> -> vector<8x128xf32>
    %c0_37 = arith.constant 0 : index
    %c0_38 = arith.constant 0 : index
    %27 = vector.load %arg7[%c0_37, %c0_38] : memref<8x128xf32, #tpu.memory_space<vmem>>, vector<8x128xf32>
    %28 = arith.addf %27, %26 : vector<8x128xf32>
    %c0_39 = arith.constant 0 : index
    %c0_40 = arith.constant 0 : index
    %29 = vector.load %arg7[%c0_39, %c0_40] : memref<8x128xf32, #tpu.memory_space<vmem>>, vector<8x128xf32>
    tpu.vector_store %arg7[%c0_39, %c0_40], %28 {strides = array<i32>} : memref<8x128xf32, #tpu.memory_space<vmem>>, vector<8x128xf32>,
    %c0_41 = arith.constant 0 : index
    %c3_42 = arith.constant 3 : index
    %c0_43 = arith.constant 0 : index
    %c0_44 = arith.constant 0 : index
    %30 = vector.load %arg2[%c0_41, %c3_42, %c0_43, %c0_44] : memref<1x4x8x256xf32, #tpu.memory_space<vmem>>, vector<1x1x8x128xf32>
    %31 = vector.shape_cast %30 : vector<1x1x8x128xf32> to vector<8x128xf32>
    %c4 = arith.constant 4 : index
    %c0_45 = arith.constant 0 : index
    %c0_46 = arith.constant 0 : index
    %32 = vector.load %arg3[%c4, %c0_45, %c0_46] : memref<9x8x8xf32, #tpu.memory_space<vmem>>, vector<1x8x8xf32>
    %33 = vector.shape_cast %32 : vector<1x8x8xf32> to vector<8x8xf32>
    %cst_47 = arith.constant dense<0.000000e+00> : vector<8x128xf32>
    %34 = tpu.matmul %33, %31, %cst_47 {dimension_numbers = #tpu.dot_dimension_numbers<[1], [0], [0], [1], [0, 0, 1, 1], [], []>} : vector<8x8xf32>, vector<8x128xf32>, vector<8x128xf32> -> vector<8x128xf32>
    %c0_48 = arith.constant 0 : index
    %c0_49 = arith.constant 0 : index
    %35 = vector.load %arg7[%c0_48, %c0_49] : memref<8x128xf32, #tpu.memory_space<vmem>>, vector<8x128xf32>
    %36 = arith.addf %35, %34 : vector<8x128xf32>
    %c0_50 = arith.constant 0 : index
    %c0_51 = arith.constant 0 : index
    %37 = vector.load %arg7[%c0_50, %c0_51] : memref<8x128xf32, #tpu.memory_space<vmem>>, vector<8x128xf32>
    tpu.vector_store %arg7[%c0_50, %c0_51], %36 {strides = array<i32>} : memref<8x128xf32, #tpu.memory_space<vmem>>, vector<8x128xf32>,
    %c0_52 = arith.constant 0 : index
    %c2_53 = arith.constant 2 : index
    %c0_54 = arith.constant 0 : index
    %c1_55 = arith.constant 1 : index
    %38 = vector.load %arg2[%c0_52, %c2_53, %c0_54, %c1_55] : memref<1x4x8x256xf32, #tpu.memory_space<vmem>>, vector<1x1x8x128xf32>
    %39 = vector.shape_cast %38 : vector<1x1x8x128xf32> to vector<8x128xf32>
    %c5 = arith.constant 5 : index
    %c0_56 = arith.constant 0 : index
    %c0_57 = arith.constant 0 : index
    %40 = vector.load %arg3[%c5, %c0_56, %c0_57] : memref<9x8x8xf32, #tpu.memory_space<vmem>>, vector<1x8x8xf32>
    %41 = vector.shape_cast %40 : vector<1x8x8xf32> to vector<8x8xf32>
    %cst_58 = arith.constant dense<0.000000e+00> : vector<8x128xf32>
    %42 = tpu.matmul %41, %39, %cst_58 {dimension_numbers = #tpu.dot_dimension_numbers<[1], [0], [0], [1], [0, 0, 1, 1], [], []>} : vector<8x8xf32>, vector<8x128xf32>, vector<8x128xf32> -> vector<8x128xf32>
    %c0_59 = arith.constant 0 : index
    %c0_60 = arith.constant 0 : index
    %43 = vector.load %arg7[%c0_59, %c0_60] : memref<8x128xf32, #tpu.memory_space<vmem>>, vector<8x128xf32>
    %44 = arith.addf %43, %42 : vector<8x128xf32>
    %c0_61 = arith.constant 0 : index
    %c0_62 = arith.constant 0 : index
    %45 = vector.load %arg7[%c0_61, %c0_62] : memref<8x128xf32, #tpu.memory_space<vmem>>, vector<8x128xf32>
    tpu.vector_store %arg7[%c0_61, %c0_62], %44 {strides = array<i32>} : memref<8x128xf32, #tpu.memory_space<vmem>>, vector<8x128xf32>,
    %c0_63 = arith.constant 0 : index
    %c0_64 = arith.constant 0 : index
    %c0_65 = arith.constant 0 : index
    %c9 = arith.constant 9 : index
    %46 = vector.load %arg2[%c0_63, %c0_64, %c0_65, %c9] : memref<1x4x8x256xf32, #tpu.memory_space<vmem>>, vector<1x1x8x128xf32>
    %47 = vector.shape_cast %46 : vector<1x1x8x128xf32> to vector<8x128xf32>
    %c6 = arith.constant 6 : index
    %c0_66 = arith.constant 0 : index
    %c0_67 = arith.constant 0 : index
    %48 = vector.load %arg3[%c6, %c0_66, %c0_67] : memref<9x8x8xf32, #tpu.memory_space<vmem>>, vector<1x8x8xf32>
    %49 = vector.shape_cast %48 : vector<1x8x8xf32> to vector<8x8xf32>
    %cst_68 = arith.constant dense<0.000000e+00> : vector<8x128xf32>
    %50 = tpu.matmul %49, %47, %cst_68 {dimension_numbers = #tpu.dot_dimension_numbers<[1], [0], [0], [1], [0, 0, 1, 1], [], []>} : vector<8x8xf32>, vector<8x128xf32>, vector<8x128xf32> -> vector<8x128xf32>
    %c0_69 = arith.constant 0 : index
    %c0_70 = arith.constant 0 : index
    %51 = vector.load %arg7[%c0_69, %c0_70] : memref<8x128xf32, #tpu.memory_space<vmem>>, vector<8x128xf32>
    %52 = arith.addf %51, %50 : vector<8x128xf32>
    %c0_71 = arith.constant 0 : index
    %c0_72 = arith.constant 0 : index
    %53 = vector.load %arg7[%c0_71, %c0_72] : memref<8x128xf32, #tpu.memory_space<vmem>>, vector<8x128xf32>
    tpu.vector_store %arg7[%c0_71, %c0_72], %52 {strides = array<i32>} : memref<8x128xf32, #tpu.memory_space<vmem>>, vector<8x128xf32>,
    %c0_73 = arith.constant 0 : index
    %c1_74 = arith.constant 1 : index
    %c0_75 = arith.constant 0 : index
    %c9_76 = arith.constant 9 : index
    %54 = vector.load %arg2[%c0_73, %c1_74, %c0_75, %c9_76] : memref<1x4x8x256xf32, #tpu.memory_space<vmem>>, vector<1x1x8x128xf32>
    %55 = vector.shape_cast %54 : vector<1x1x8x128xf32> to vector<8x128xf32>
    %c7 = arith.constant 7 : index
    %c0_77 = arith.constant 0 : index
    %c0_78 = arith.constant 0 : index
    %56 = vector.load %arg3[%c7, %c0_77, %c0_78] : memref<9x8x8xf32, #tpu.memory_space<vmem>>, vector<1x8x8xf32>
    %57 = vector.shape_cast %56 : vector<1x8x8xf32> to vector<8x8xf32>
    %cst_79 = arith.constant dense<0.000000e+00> : vector<8x128xf32>
    %58 = tpu.matmul %57, %55, %cst_79 {dimension_numbers = #tpu.dot_dimension_numbers<[1], [0], [0], [1], [0, 0, 1, 1], [], []>} : vector<8x8xf32>, vector<8x128xf32>, vector<8x128xf32> -> vector<8x128xf32>
    %c0_80 = arith.constant 0 : index
    %c0_81 = arith.constant 0 : index
    %59 = vector.load %arg7[%c0_80, %c0_81] : memref<8x128xf32, #tpu.memory_space<vmem>>, vector<8x128xf32>
    %60 = arith.addf %59, %58 : vector<8x128xf32>
    %c0_82 = arith.constant 0 : index
    %c0_83 = arith.constant 0 : index
    %61 = vector.load %arg7[%c0_82, %c0_83] : memref<8x128xf32, #tpu.memory_space<vmem>>, vector<8x128xf32>
    tpu.vector_store %arg7[%c0_82, %c0_83], %60 {strides = array<i32>} : memref<8x128xf32, #tpu.memory_space<vmem>>, vector<8x128xf32>,
    %c0_84 = arith.constant 0 : index
    %c0_85 = arith.constant 0 : index
    %c0_86 = arith.constant 0 : index
    %c10 = arith.constant 10 : index
    %62 = vector.load %arg2[%c0_84, %c0_85, %c0_86, %c10] : memref<1x4x8x256xf32, #tpu.memory_space<vmem>>, vector<1x1x8x128xf32>
    %63 = vector.shape_cast %62 : vector<1x1x8x128xf32> to vector<8x128xf32>
    %c8 = arith.constant 8 : index
    %c0_87 = arith.constant 0 : index
    %c0_88 = arith.constant 0 : index
    %64 = vector.load %arg3[%c8, %c0_87, %c0_88] : memref<9x8x8xf32, #tpu.memory_space<vmem>>, vector<1x8x8xf32>
    %65 = vector.shape_cast %64 : vector<1x8x8xf32> to vector<8x8xf32>
    %cst_89 = arith.constant dense<0.000000e+00> : vector<8x128xf32>
    %66 = tpu.matmul %65, %63, %cst_89 {dimension_numbers = #tpu.dot_dimension_numbers<[1], [0], [0], [1], [0, 0, 1, 1], [], []>} : vector<8x8xf32>, vector<8x128xf32>, vector<8x128xf32> -> vector<8x128xf32>
    %c0_90 = arith.constant 0 : index
    %c0_91 = arith.constant 0 : index
    %67 = vector.load %arg7[%c0_90, %c0_91] : memref<8x128xf32, #tpu.memory_space<vmem>>, vector<8x128xf32>
    %68 = arith.addf %67, %66 : vector<8x128xf32>
    %c0_92 = arith.constant 0 : index
    %c0_93 = arith.constant 0 : index
    %69 = vector.load %arg7[%c0_92, %c0_93] : memref<8x128xf32, #tpu.memory_space<vmem>>, vector<8x128xf32>
    tpu.vector_store %arg7[%c0_92, %c0_93], %68 {strides = array<i32>} : memref<8x128xf32, #tpu.memory_space<vmem>>, vector<8x128xf32>,
    %c0_94 = arith.constant 0 : index
    %c0_95 = arith.constant 0 : index
    %70 = vector.load %arg7[%c0_94, %c0_95] : memref<8x128xf32, #tpu.memory_space<vmem>>, vector<8x128xf32>
    %c0_96 = arith.constant 0 : index
    %c0_97 = arith.constant 0 : index
    %71 = vector.load %arg4[%c0_96, %c0_97] : memref<8x1xf32, #tpu.memory_space<vmem>>, vector<8x1xf32>
    %72 = vector.broadcast %71 : vector<8x1xf32> to vector<8x128xf32>
    %73 = arith.addf %70, %72 : vector<8x128xf32>
    %c0_98 = arith.constant 0 : index
    %c0_99 = arith.constant 0 : index
    %74 = vector.load %arg5[%c0_98, %c0_99] : memref<1x128xf32, #tpu.memory_space<vmem>>, vector<1x128xf32>
    %75 = vector.broadcast %74 : vector<1x128xf32> to vector<8x128xf32>
    %76 = arith.mulf %73, %75 : vector<8x128xf32>
    %cst_100 = arith.constant dense<0.000000e+00> : vector<8xf32>
    %77 = vector.multi_reduction <add>, %76, %cst_100 [1] : vector<8x128xf32> to vector<8xf32>
    %78 = vector.shape_cast %77 : vector<8xf32> to vector<8x1xf32>
    %cst_101 = arith.constant 1.562500e-02 : f32
    %79 = vector.broadcast %cst_101 : f32 to vector<8x1xf32>
    %80 = arith.mulf %78, %79 : vector<8x1xf32>
    %81 = arith.mulf %76, %76 : vector<8x128xf32>
    %cst_102 = arith.constant dense<0.000000e+00> : vector<8xf32>
    %82 = vector.multi_reduction <add>, %81, %cst_102 [1] : vector<8x128xf32> to vector<8xf32>
    %83 = vector.shape_cast %82 : vector<8xf32> to vector<8x1xf32>
    %cst_103 = arith.constant 1.562500e-02 : f32
    %84 = vector.broadcast %cst_103 : f32 to vector<8x1xf32>
    %85 = arith.mulf %83, %84 : vector<8x1xf32>
    %86 = arith.mulf %80, %80 : vector<8x1xf32>
    %87 = arith.subf %85, %86 : vector<8x1xf32>
    %cst_104 = arith.constant 0.000000e+00 : f32
    %88 = vector.broadcast %cst_104 : f32 to vector<8x1xf32>
    %89 = arith.maximumf %87, %88 : vector<8x1xf32>
    %cst_105 = arith.constant 9.99999974E-6 : f32
    %90 = vector.broadcast %cst_105 : f32 to vector<8x1xf32>
    %91 = arith.addf %89, %90 : vector<8x1xf32>
    %92 = math.rsqrt %91 : vector<8x1xf32>
    %93 = vector.broadcast %80 : vector<8x1xf32> to vector<8x128xf32>
    %94 = arith.subf %73, %93 : vector<8x128xf32>
    %95 = vector.broadcast %92 : vector<8x1xf32> to vector<8x128xf32>
    %96 = arith.mulf %94, %95 : vector<8x128xf32>
    %cst_106 = arith.constant 0.000000e+00 : f32
    %97 = vector.broadcast %cst_106 : f32 to vector<8x128xf32>
    %98 = arith.maximumf %96, %97 : vector<8x128xf32>
    %c0_107 = arith.constant 0 : index
    %c0_108 = arith.constant 0 : index
    %c0_109 = arith.constant 0 : index
    %99 = vector.load %arg6[%c0_107, %c0_108, %c0_109] : memref<1x8x128xf32, #tpu.memory_space<vmem>>, vector<1x8x128xf32>
    %100 = vector.shape_cast %99 : vector<1x8x128xf32> to vector<8x128xf32>
    %101 = vector.shape_cast %98 : vector<8x128xf32> to vector<1x8x128xf32>
    tpu.vector_store %arg6[%c0_107, %c0_108, %c0_109], %101 {strides = array<i32>} : memref<1x8x128xf32, #tpu.memory_space<vmem>>, vector<1x8x128xf32>,
    return
  }
  func.func @transform_0(%arg0: i32, %arg1: i32) -> (i32, i32, i32, i32) {
    %c0_i32 = arith.constant 0 : i32
    %c0_i32_0 = arith.constant 0 : i32
    %c0_i32_1 = arith.constant 0 : i32
    %c0_i32_2 = arith.constant 0 : i32
    return %arg0, %c0_i32, %c0_i32_0, %c0_i32_1 : i32, i32, i32, i32
  }
  func.func @transform_1(%arg0: i32, %arg1: i32) -> (i32, i32, i32) {
    %c0_i32 = arith.constant 0 : i32
    %c0_i32_0 = arith.constant 0 : i32
    %c0_i32_1 = arith.constant 0 : i32
    return %c0_i32, %arg1, %c0_i32_0 : i32, i32, i32
  }
  func.func @transform_2(%arg0: i32, %arg1: i32) -> (i32, i32) {
    %c0_i32 = arith.constant 0 : i32
    %c0_i32_0 = arith.constant 0 : i32
    return %arg1, %c0_i32 : i32, i32
  }
  func.func @transform_3(%arg0: i32, %arg1: i32) -> (i32, i32) {
    %c0_i32 = arith.constant 0 : i32
    %c0_i32_0 = arith.constant 0 : i32
    %c0_i32_1 = arith.constant 0 : i32
    return %c0_i32, %c0_i32_0 : i32, i32
  }
  func.func @transform_4(%arg0: i32, %arg1: i32) -> (i32, i32, i32) {
    %c0_i32 = arith.constant 0 : i32
    %c0_i32_0 = arith.constant 0 : i32
    return %arg0, %arg1, %c0_i32 : i32, i32, i32
  }
}

</mosaic_0001>

<bundles_post_ra>
// kernel: conv_block_forward.1
= control target key start
LH: loop header
LB: loop body
LE: loop exit
PB: predicated region body
PF: predicated region fallthrough
CT: control target
= control target key end

     0   :  { %s848_s15 = smov 0   ;;  %s850_s16 = smov 0   ;;  %s931_s0 = inlined_call_operand.vmem [shape: f32[2,4,8,256], index: 0, kind: input, shape index: {}]   ;;  %s932_s1 = inlined_call_operand.vmem [shape: f32[9,8,8], index: 1, kind: input, shape index: {}]   ;;  %s933_s2 = inlined_call_operand.vmem [shape: f32[8,1], index: 2, kind: input, shape index: {}]   ;;  %s934_s3 = inlined_call_operand.vmem [shape: f32[1,128], index: 3, kind: input, shape index: {}]   ;;  %s935_s4 = inlined_call_operand.vmem [shape: f32[2,8,128], index: 4, kind: output, shape index: {}]  }
   0x1   :  { %s852_s17 = smov 0  }
   0x2 LB: > { %s26_s18 = sadd.s32 1, %s813_s16  ;;  %p706_p0 = scmp.ge.s32.totalorder %s817_s17, 1  ;;  %s817_s17 = sphi %s852_s17, %s14_s17   ;;  %s813_s16 = sphi %s850_s16, %s937_s16   ;;  %s809_s15 = sphi %s848_s15, %s936_s15  }
   0x3   : > { %p28_p1 = scmp.ge.s32.totalorder %s26_s18, 2  ;;  %p194_p2 = scmp.lt.s32.totalorder %s817_s17, 3 }
   0x5   : > { %s939_s18 = smov (%p28_p1, %s26_s18), 0  ;;  %p195_p3 = pnand %p706_p0, %p194_p2 }
   0x6   : > { %p230_p4 = scmp.lt.s32.totalorder (!%p195_p3), %s809_s15, 1  ;;  %s819_s23 = smov (!%p195_p3), 127  }
   0x7   : > { %198 = sbr.rel (%p195_p3) target bundleno = 436 (0x1b4), region = 36  ;;  %s820_s24 = smov (!%p195_p3), 118  }
   0x8   : > { %s821_s25 = smov (!%p195_p3), 119  }
   0xc   : > { %s941_s15 = smov (!%p230_p4, %s809_s15), 1  ;;  %vm252_vm0 = vcmask 64512   ;;  %v251_v9 = vld [vmem:[%s932_s1] sm:$0xff]  ;;  %v717_v10 = vld [vmem:[%s932_s1 + $0x18] sm:$0xff]  ;;  %v712_v11 = vld [vmem:[%s932_s1 + $0x8] sm:$0xff]  ;;  %vm531_vm1 = vcmask 965632  }
   0xd   : > { %s736_s19 = sshll.u32 %s941_s15, 6  ;;  %v720_v13 = vld [vmem:[%s932_s1 + $0x20] sm:$0xff]  ;;  %v822_v18 = vmov 0   ;;  %vm317_vm2 = vcmask 1039360   ;;  %vm454_vm3 = vcmask 973824   ;;  %v714_v27 = vld [vmem:[%s932_s1 + $0x10] sm:$0xff] }
   0xe   : > { %s234_s22 = scalar_lea.vmem %s931_s0, %s736_s19  ;;  %v561_v15 = vld [vmem:[%s933_s2] sm:$0xff]  ;;  %790 = vset.pattern.permute.xlu2 %v822_v18  ;;  %791 = vset.pattern.permute.xlu0 %v822_v18  ;;  %v730_v29 = vld [vmem:[%s932_s1 + $0x38] sm:$0xff]  ;;  %v726_v37 = vld [vmem:[%s932_s1 + $0x30] sm:$0xff]  ;;  %s709_s26 = sshll.u32 %s941_s15, 3 }
   0xf   : > { %v307_v0 = vld [vmem:[%s234_s22] sm:$0xff]  ;;  %v308_v1 = vld [vmem:[%s234_s22 + $0x8] sm:$0xff]  ;;  %v728_v2 = vld [vmem:[%s234_s22 + $0x10] sm:$0xff]  ;;  %s249_s29 = scalar_lea.vmem %s935_s4, %s709_s26 }
  0x10   : > { %v765_v3 = vpack.i.bf16 %v308_v1, %v307_v0  ;;  %v729_v4 = vld [vmem:[%s234_s22 + $0x18] sm:$0xff]  ;;  %v722_v5 = vld [vmem:[%s234_s22 + $0x20] sm:$0xff]  ;;  %271 = vmatpush.msra.mxu0 %v307_v0  ;;  %299 = vmatpush.msra.mxu1 %v728_v2  ;;  %v723_v7 = vld [vmem:[%s234_s22 + $0x28] sm:$0xff] }
  0x11   : > { %v775_v6 = vpack.i.bf16 %v729_v4, %v728_v2  ;;  %368 = vmatpush.msra.mxu3 %v722_v5  ;;  %v780_v8 = vpack.i.bf16 %v723_v7, %v722_v5  ;;  %710 = vmatmul.msk.f32.vlgmr.msra.gmra.mxu0 %vm252_vm0, %v251_v9  ;;  %v719_v12 = vld [vmem:[%s234_s22 + $0x30] sm:$0xff]  ;;  %v732_v20 = vld [vmem:[%s932_s1 + $0x40] sm:$0xff]  ;;  %v724_v39 = vld [vmem:[%s932_s1 + $0x28] sm:$0xff] }
  0x12   : > { %766 = vrot.lane.b32.xlu0 %v765_v3, %s819_s23  ;;  %786 = vrot.lane.b32.xlu2 %v765_v3, %s820_s24  ;;  %v792_v59 = vld [vmem:[%s934_s3] ss:$0 sm:$0xff] }
  0x13   : > { %776 = vrot.lane.b32.xlu1 %v775_v6, %s821_s25  ;;  %718 = vmatmul.msk.f32.vlgmr.msra.gmra.mxu3 %vm252_vm0, %v717_v10 }
  0x14   : > { %713 = vmatmul.msk.f32.vlgmr.msra.gmra.mxu1 %vm252_vm0, %v712_v11  ;;  %398 = vmatpush.msrb.mxu0 %v719_v12 }
  0x19   : > { %721 = vmatmul.msk.f32.vlgmr.msrb.gmra.mxu0 %vm252_vm0, %v720_v13 }
  0x1a   : > { %771 = vrot.lane.b32.xlu0 %v765_v3, %s821_s25  ;;  %564 = vperm.xlu2 %790, %v561_v15  }
  0x1b   : > { %781 = vrot.lane.b32.xlu1 %v780_v8, %s819_s23 }
  0x6c   : > { %v787_v14 = vpop.permute.xlu2 %786 }
  0x6d   : > { %v789_v16 = vunpack.i.h.bf16 %v787_v14  ;;  %v788_v17 = vunpack.i.l.bf16 %v787_v14 }
  0x6f   : > { %v532_v19 = vsel %vm531_vm1, %v788_v17, %v789_v16 }
  0x70   : > { %552 = vmatpush.msra.mxu0 %v532_v19 }
  0x71   : > { %733 = vmatmul.msk.f32.vlgmr.msra.gmra.mxu0 %vm252_vm0, %v732_v20 }
  0x74   : > { %v565_v57 = vpop.permute.xlu2 %564 }
  0x84   : > { %v767_v21 = vpop.permute.xlu0 %766 }
  0x85   : > { %v769_v22 = vunpack.i.h.bf16 %v767_v21  ;;  %v768_v23 = vunpack.i.l.bf16 %v767_v21  ;;  %v777_v24 = vpop.permute.xlu1 %776 }
  0x86   : > { %v779_v25 = vunpack.i.h.bf16 %v777_v24  ;;  %v778_v26 = vunpack.i.l.bf16 %v777_v24 }
  0x87   : > { %v318_v28 = vsel %vm317_vm2, %v768_v23, %v769_v22 }
  0x88   : > { %338 = vmatpush.msra.mxu2 %v318_v28  ;;  %v493_v30 = vsel %vm454_vm3, %v778_v26, %v779_v25 }
  0x89   : > { %715 = vmatmul.msk.f32.vlgmr.msra.gmra.mxu2 %vm252_vm0, %v714_v27  ;;  %513 = vmatpush.msrb.mxu3 %v493_v30 }
  0x8a   : > { %731 = vmatmul.msk.f32.vlgmr.msrb.gmra.mxu3 %vm252_vm0, %v730_v29 }
  0x8c   : > { %v772_v31 = vpop.permute.xlu0 %771 }
  0x8d   : > { %v774_v32 = vunpack.i.h.bf16 %v772_v31  ;;  %v773_v33 = vunpack.i.l.bf16 %v772_v31  ;;  %v782_v34 = vpop.permute.xlu1 %781 }
  0x8e   : > { %v784_v35 = vunpack.i.h.bf16 %v782_v34  ;;  %v783_v36 = vunpack.i.l.bf16 %v782_v34  ;;  %v273_v41 = vpop.f32.mrf.mxu0 }
  0x8f   : > { %v455_v38 = vsel %vm454_vm3, %v773_v33, %v774_v32 }
  0x90   : > { %475 = vmatpush.msrb.mxu2 %v455_v38  ;;  %v416_v40 = vsel %vm317_vm2, %v783_v36, %v784_v35 }
  0x91   : > { %727 = vmatmul.msk.f32.vlgmr.msrb.gmra.mxu2 %vm252_vm0, %v726_v37  ;;  %436 = vmatpush.msrb.mxu1 %v416_v40  ;;  %v301_v42 = vpop.f32.mrf.mxu1 }
  0x92   : > { %725 = vmatmul.msk.f32.vlgmr.msrb.gmra.mxu1 %vm252_vm0, %v724_v39  ;;  %v305_v44 = vadd.f32 %v301_v42, %v273_v41 }
  0x96   : > { %v370_v43 = vpop.f32.mrf.mxu3  ;;  %v400_v46 = vpop.f32.mrf.mxu0 }
  0xee   : > { %v554_v55 = vpop.f32.mrf.mxu0 }
 0x10c   : > { %v340_v45 = vpop.f32.mrf.mxu2 }
 0x10d   : > { %v344_v47 = vadd.f32 %v340_v45, %v305_v44  ;;  %v515_v53 = vpop.f32.mrf.mxu3 }
 0x10f   : > { %v374_v48 = vadd.f32 %v370_v43, %v344_v47  ;;  %v438_v49 = vpop.f32.mrf.mxu1 }
 0x111   : > { %v404_v50 = vadd.f32 %v400_v46, %v374_v48 }
 0x113   : > { %v442_v51 = vadd.f32 %v438_v49, %v404_v50 }
 0x114   : > { %v477_v52 = vpop.f32.mrf.mxu2 }
 0x115   : > { %v481_v54 = vadd.f32 %v477_v52, %v442_v51 }
 0x117   : > { %v519_v56 = vadd.f32 %v515_v53, %v481_v54 }
 0x119   : > { %v558_v58 = vadd.f32 %v554_v55, %v519_v56 }
 0x11b   : > { %v567_v60 = vadd.f32 %v565_v57, %v558_v58 }
 0x11d   : > { %v572_v61 = vmul.f32 %v792_v59, %v567_v60 }
 0x11f   : > { %573 = vadd.xlane.f32.xlu0 %v572_v61  ;;  %v576_v62 = vmul.f32 %v572_v61, %v572_v61 }
 0x121   : > { %577 = vadd.xlane.f32.xlu1 %v576_v62 }
 0x192   : > { %v574_v63 = vpop.xlane.xlu0 %573 }
 0x193   : > { %v575_v0 = vmul.f32 0.015625, %v574_v63 }
 0x194   : > { %v578_v1 = vpop.xlane.xlu1 %577 }
 0x195   : > { %v580_v2 = vmul.f32 %v575_v0, %v575_v0  ;;  %v579_v3 = vmul.f32 0.015625, %v578_v1  ;;  %v594_v13 = vsub.f32 %v567_v60, %v575_v0 }
 0x197   : > { %v581_v4 = vsub.f32 %v579_v3, %v580_v2 }
 0x199   : > { %v582_v5 = vmax.f32 %v581_v4, 0.0 }
 0x19b   : > { %v583_v6 = vadd.f32 1e-05, %v582_v5 }
 0x19d   : > { %793 = vrsqrt.f32 %v583_v6  ;;  %vm590_vm5 = vweird.f32 %v583_v6 }
 0x1a3   : > { %v794_v7 = vpop.eup %793 }
 0x1a4   : > { %v585_v8 = vmul.f32 %v794_v7, %v583_v6  ;;  %vm591_vm4 = vweird.f32 %v794_v7 }
 0x1a5   : > { %vm592_vm6 = vmor %vm590_vm5, %vm591_vm4 }
 0x1a6   : > { %v586_v9 = vmul.f32 %v794_v7, %v585_v8 }
 0x1a8   : > { %v587_v10 = vmul.f32 0.5, %v586_v9 }
 0x1aa   : > { %v588_v11 = vsub.f32 1.5, %v587_v10 }
 0x1ac   : > { %v589_v12 = vmul.f32 %v794_v7, %v588_v11 }
 0x1ae   : > { %v593_v14 = vsel %vm592_vm6, %v794_v7, %v589_v12 }
 0x1af   : > { %v595_v15 = vmul.f32 %v594_v13, %v593_v14 }
 0x1b1   : > { %v596_v16 = vmax.f32 %v595_v15, 0.0 }
 0x1b3   : > { %597 = vst [vmem:[%s249_s29] sm:$0xff] %v596_v16 }
 0x1b4 PF: > { %s14_s17 = sadd.s32 1, %s817_s17   ;;  %s936_s15 = smov %s813_s16 }
 0x1b5   : > { %p11_p5 = scmp.ge.s32.totalorder %s14_s17, 4   ;;  %s937_s16 = smov %s939_s18 }
 0x1b7   :  { %13 = sbr.rel (!%p11_p5) target bundleno = 2 (0x2), region = 83 }

</bundles_post_ra>
